<compile_context>
chip_gen: v6e
topology: v6e:2x2x1
jax: 0.10.0
libtpu: 0.0.40
codegen_flags: <defaults>
</compile_context>

<pallas_src>
import functools

import jax
import jax.numpy as jnp
from jax.experimental import pallas as pl
from jax.experimental.pallas import tpu as pltpu


def _causal_net_kernel(D, x_ref, m_ref,
                       w1_ref, w2_ref, w3a_ref, w3b_ref,
                       b123_ref, w4_ref, b4_ref,
                       o_ref):
    # Packed biases: rows of b123 are [b1; b2; b3], each [1, H].
    b1 = b123_ref[0:1, :]
    b2 = b123_ref[1:2, :]
    b3 = b123_ref[2:3, :]

    # Encoder: Linear -> ReLU -> Linear -> ReLU
    x = x_ref[...]
    h1 = jnp.maximum(
        jnp.dot(x, w1_ref[...], preferred_element_type=jnp.float32) + b1, 0.0)
    h2 = jnp.maximum(
        jnp.dot(h1, w2_ref[...], preferred_element_type=jnp.float32) + b2, 0.0)

    # Edge predictor layer 1 on concat([features, mask]) == h2 @ W3a + mask @ W3b
    h3 = jnp.maximum(
        jnp.dot(h2, w3a_ref[...], preferred_element_type=jnp.float32)
        + jnp.dot(m_ref[...], w3b_ref[...], preferred_element_type=jnp.float32)
        + b3, 0.0)

    # Edge predictor layer 2 -> sigmoid -> zero out the diagonal.
    logits = (jnp.dot(h3, w4_ref[...], preferred_element_type=jnp.float32)
              + b4_ref[...])

    # (1 - eye(D)) flattened: diagonal entries of a row-major [D, D] matrix sit
    # at flat positions k with k % (D + 1) == 0.  Built in-kernel (VPU iota) so
    # no [1, D*D] mask is DMA'd from HBM.
    col = jax.lax.broadcasted_iota(jnp.int32, o_ref.shape, dimension=1)
    dmask = (col % (D + 1) != 0).astype(jnp.float32)

    o_ref[...] = jax.nn.sigmoid(logits) * dmask


def _vmem_limit_bytes(tb, D, H):
    """VMEM budget: resident weights + double-buffered streamed blocks + slack."""
    DD = D * D
    f32 = 4
    resident = (D * H + H * H + H * H + D * H + 3 * H + H * DD + DD) * f32
    streamed = 2 * (tb * D * 2 + tb * DD) * f32   # double-buffered x, mask, out
    est = 2 * (resident + streamed) + (8 << 20)
    # Floor for compiler scratch; cap comfortably under v7x's 64 MiB physical VMEM.
    return int(min(max(est, 16 << 20), 48 << 20))


@jax.jit
def simple_causal_net_forward(x, params, intervention_mask=None):
    """x: [B, D] float32. intervention_mask: None, [D], or [B, D]. Returns [B, D, D]."""
    B, D = x.shape
    DD = D * D
    if intervention_mask is None:
        mask = jnp.zeros((B, D), dtype=jnp.float32)
    else:
        mask = jnp.asarray(intervention_mask, dtype=jnp.float32)
        if mask.ndim == 1:
            mask = jnp.broadcast_to(mask[None, :], (B, D))

    (w1, b1, w2, b2, w3a, w3b, b3, w4, b4) = params
    H = w1.shape[1]
    b123 = jnp.concatenate([b1, b2, b3], axis=0)          # [3, H]

    # Batch tiling: whole batch when small, else 256-row blocks (multiple of 8).
    TB = B if B <= 256 else 256
    n_blocks = pl.cdiv(B, TB)
    B_pad = n_blocks * TB
    if B_pad != B:
        pad = B_pad - B
        x = jnp.pad(x, ((0, pad), (0, 0)))
        mask = jnp.pad(mask, ((0, pad), (0, 0)))

    def resident(shape):
        # Whole-array block, same block index every grid step -> stays in VMEM.
        return pl.BlockSpec(shape, lambda i: (0, 0))

    adj_flat = pl.pallas_call(
        functools.partial(_causal_net_kernel, D),
        out_shape=jax.ShapeDtypeStruct((B_pad, DD), jnp.float32),
        grid=(n_blocks,),
        in_specs=[
            pl.BlockSpec((TB, D), lambda i: (i, 0)),       # x
            pl.BlockSpec((TB, D), lambda i: (i, 0)),       # intervention mask
            resident((D, H)),                              # w1
            resident((H, H)),                              # w2
            resident((H, H)),                              # w3a (features part of W3)
            resident((D, H)),                              # w3b (mask part of W3)
            resident((3, H)),                              # packed b1/b2/b3
            resident((H, DD)),                             # w4
            resident((1, DD)),                             # b4
        ],
        out_specs=pl.BlockSpec((TB, DD), lambda i: (i, 0)),
        compiler_params=pltpu.CompilerParams(
            dimension_semantics=("parallel",),
            vmem_limit_bytes=_vmem_limit_bytes(TB, D, H),
        ),
    )(x, mask, w1, w2, w3a, w3b, b123, w4, b4)

    return adj_flat[:B].reshape(B, D, D)


def init_params(key, input_dim, hidden_dim):
    """Deterministic PyTorch-Linear-style init; weights stored [in, out]."""
    def linear(k, fan_in, fan_out):
        kw, kb = jax.random.split(k)
        bound = 1.0 / jnp.sqrt(jnp.float32(fan_in))
        w = jax.random.uniform(kw, (fan_in, fan_out), jnp.float32, -bound, bound)
        b = jax.random.uniform(kb, (1, fan_out), jnp.float32, -bound, bound)
        return w, b

    k1, k2, k3, k4 = jax.random.split(key, 4)
    w1, b1 = linear(k1, input_dim, hidden_dim)                # encoder Linear 1
    w2, b2 = linear(k2, hidden_dim, hidden_dim)               # encoder Linear 2
    w3, b3 = linear(k3, hidden_dim + input_dim, hidden_dim)   # edge_predictor Linear 1
    w4, b4 = linear(k4, hidden_dim, input_dim * input_dim)    # edge_predictor Linear 2
    # Split W3 into the part multiplying encoder features and the part
    # multiplying the intervention mask (concat order: [features, mask]).
    w3a = w3[:hidden_dim, :]
    w3b = w3[hidden_dim:, :]
    return (w1, b1, w2, b2, w3a, w3b, b3, w4, b4)


def _reference_forward(x, params, intervention_mask=None):
    """Pure-JAX reference mirroring the PyTorch forward, for correctness checks."""
    B, D = x.shape
    (w1, b1, w2, b2, w3a, w3b, b3, w4, b4) = params
    if intervention_mask is None:
        mask = jnp.zeros((B, D), dtype=jnp.float32)
    else:
        mask = jnp.asarray(intervention_mask, dtype=jnp.float32)
        if mask.ndim == 1:
            mask = jnp.broadcast_to(mask[None, :], (B, D))
    h = jax.nn.relu(x @ w1 + b1)
    h = jax.nn.relu(h @ w2 + b2)
    h = jax.nn.relu(h @ w3a + mask @ w3b + b3)
    adj = jax.nn.sigmoid(h @ w4 + b4).reshape(B, D, D)
    return adj * (1.0 - jnp.eye(D))[None, :, :]


if __name__ == "__main__":
    INPUT_DIM = 4
    HIDDEN_DIM = 32
    BATCH = 8

    key = jax.random.PRNGKey(0)
    kx, kp, km, kx2 = jax.random.split(key, 4)

    x = jax.random.normal(kx, (BATCH, INPUT_DIM), dtype=jnp.float32)
    params = init_params(kp, INPUT_DIM, HIDDEN_DIM)
    intervention_mask = (jax.random.uniform(km, (BATCH, INPUT_DIM)) > 0.5).astype(jnp.float32)

    # case 1: no intervention mask (zero padding path)
    out_none = simple_causal_net_forward(x, params, None)
    # case 2: with per-sample intervention mask
    out_mask = simple_causal_net_forward(x, params, intervention_mask)
    # case 3: larger batch -> exercises multi-block grid + batch padding path
    x_big = jax.random.normal(kx2, (300, INPUT_DIM), dtype=jnp.float32)
    out_big = simple_causal_net_forward(x_big, params, None)

    jax.block_until_ready(out_none)
    jax.block_until_ready(out_mask)
    jax.block_until_ready(out_big)

    ref_none = _reference_forward(x, params, None)
    ref_mask = _reference_forward(x, params, intervention_mask)
    ref_big = _reference_forward(x_big, params, None)

    assert out_none.shape == (BATCH, INPUT_DIM, INPUT_DIM)
    assert out_mask.shape == (BATCH, INPUT_DIM, INPUT_DIM)
    assert out_big.shape == (300, INPUT_DIM, INPUT_DIM)
    assert jnp.allclose(out_none, ref_none, atol=1e-5, rtol=1e-5)
    assert jnp.allclose(out_mask, ref_mask, atol=1e-5, rtol=1e-5)
    assert jnp.allclose(out_big, ref_big, atol=1e-5, rtol=1e-5)

    print("KERNEL_OK")
</pallas_src>

<mosaic_0001>
module attributes {stable_mosaic.version = 11 : i64} {
  func.func @_causal_net_kernel(%arg0: i32, %arg1: memref<8x4xf32, #tpu.memory_space<vmem>>, %arg2: memref<8x4xf32, #tpu.memory_space<vmem>>, %arg3: memref<4x32xf32, #tpu.memory_space<vmem>>, %arg4: memref<32x32xf32, #tpu.memory_space<vmem>>, %arg5: memref<32x32xf32, #tpu.memory_space<vmem>>, %arg6: memref<4x32xf32, #tpu.memory_space<vmem>>, %arg7: memref<3x32xf32, #tpu.memory_space<vmem>>, %arg8: memref<32x16xf32, #tpu.memory_space<vmem>>, %arg9: memref<1x16xf32, #tpu.memory_space<vmem>>, %arg10: memref<8x16xf32, #tpu.memory_space<vmem>>) attributes {dimension_semantics = [#tpu.dimension_semantics<parallel>], iteration_bounds = array<i64: 1>, scalar_prefetch = 0 : i64, scratch_operands = 0 : i64, tpu.core_type = #tpu.core_type<tc>, window_params = [{transform_indices = @transform_0, window_bounds = array<i64: 8, 4>}, {transform_indices = @transform_1, window_bounds = array<i64: 8, 4>}, {pipeline_mode = #tpu.pipeline_mode<synchronous>, transform_indices = @transform_2, window_bounds = array<i64: 4, 32>}, {pipeline_mode = #tpu.pipeline_mode<synchronous>, transform_indices = @transform_3, window_bounds = array<i64: 32, 32>}, {pipeline_mode = #tpu.pipeline_mode<synchronous>, transform_indices = @transform_4, window_bounds = array<i64: 32, 32>}, {pipeline_mode = #tpu.pipeline_mode<synchronous>, transform_indices = @transform_5, window_bounds = array<i64: 4, 32>}, {pipeline_mode = #tpu.pipeline_mode<synchronous>, transform_indices = @transform_6, window_bounds = array<i64: 3, 32>}, {pipeline_mode = #tpu.pipeline_mode<synchronous>, transform_indices = @transform_7, window_bounds = array<i64: 32, 16>}, {pipeline_mode = #tpu.pipeline_mode<synchronous>, transform_indices = @transform_8, window_bounds = array<i64: 1, 16>}, {transform_indices = @transform_9, window_bounds = array<i64: 8, 16>}]} {
    %c0 = arith.constant 0 : index
    %c0_0 = arith.constant 0 : index
    %0 = vector.load %arg7[%c0, %c0_0] : memref<3x32xf32, #tpu.memory_space<vmem>>, vector<1x32xf32>
    %c1 = arith.constant 1 : index
    %c0_1 = arith.constant 0 : index
    %1 = vector.load %arg7[%c1, %c0_1] : memref<3x32xf32, #tpu.memory_space<vmem>>, vector<1x32xf32>
    %c2 = arith.constant 2 : index
    %c0_2 = arith.constant 0 : index
    %2 = vector.load %arg7[%c2, %c0_2] : memref<3x32xf32, #tpu.memory_space<vmem>>, vector<1x32xf32>
    %c0_3 = arith.constant 0 : index
    %c0_4 = arith.constant 0 : index
    %3 = vector.load %arg1[%c0_3, %c0_4] : memref<8x4xf32, #tpu.memory_space<vmem>>, vector<8x4xf32>
    %c0_5 = arith.constant 0 : index
    %c0_6 = arith.constant 0 : index
    %4 = vector.load %arg3[%c0_5, %c0_6] : memref<4x32xf32, #tpu.memory_space<vmem>>, vector<4x32xf32>
    %cst = arith.constant dense<0.000000e+00> : vector<8x32xf32>
    %5 = tpu.matmul %3, %4, %cst {dimension_numbers = #tpu.dot_dimension_numbers<[1], [0], [0], [1], [0, 0, 1, 1], [], []>} : vector<8x4xf32>, vector<4x32xf32>, vector<8x32xf32> -> vector<8x32xf32>
    %6 = vector.broadcast %0 : vector<1x32xf32> to vector<8x32xf32>
    %7 = arith.addf %5, %6 : vector<8x32xf32>
    %cst_7 = arith.constant 0.000000e+00 : f32
    %8 = vector.broadcast %cst_7 : f32 to vector<8x32xf32>
    %9 = arith.maximumf %7, %8 : vector<8x32xf32>
    %c0_8 = arith.constant 0 : index
    %c0_9 = arith.constant 0 : index
    %10 = vector.load %arg4[%c0_8, %c0_9] : memref<32x32xf32, #tpu.memory_space<vmem>>, vector<32x32xf32>
    %cst_10 = arith.constant dense<0.000000e+00> : vector<8x32xf32>
    %11 = tpu.matmul %9, %10, %cst_10 {dimension_numbers = #tpu.dot_dimension_numbers<[1], [0], [0], [1], [0, 0, 1, 1], [], []>} : vector<8x32xf32>, vector<32x32xf32>, vector<8x32xf32> -> vector<8x32xf32>
    %12 = vector.broadcast %1 : vector<1x32xf32> to vector<8x32xf32>
    %13 = arith.addf %11, %12 : vector<8x32xf32>
    %cst_11 = arith.constant 0.000000e+00 : f32
    %14 = vector.broadcast %cst_11 : f32 to vector<8x32xf32>
    %15 = arith.maximumf %13, %14 : vector<8x32xf32>
    %c0_12 = arith.constant 0 : index
    %c0_13 = arith.constant 0 : index
    %16 = vector.load %arg5[%c0_12, %c0_13] : memref<32x32xf32, #tpu.memory_space<vmem>>, vector<32x32xf32>
    %cst_14 = arith.constant dense<0.000000e+00> : vector<8x32xf32>
    %17 = tpu.matmul %15, %16, %cst_14 {dimension_numbers = #tpu.dot_dimension_numbers<[1], [0], [0], [1], [0, 0, 1, 1], [], []>} : vector<8x32xf32>, vector<32x32xf32>, vector<8x32xf32> -> vector<8x32xf32>
    %c0_15 = arith.constant 0 : index
    %c0_16 = arith.constant 0 : index
    %18 = vector.load %arg2[%c0_15, %c0_16] : memref<8x4xf32, #tpu.memory_space<vmem>>, vector<8x4xf32>
    %c0_17 = arith.constant 0 : index
    %c0_18 = arith.constant 0 : index
    %19 = vector.load %arg6[%c0_17, %c0_18] : memref<4x32xf32, #tpu.memory_space<vmem>>, vector<4x32xf32>
    %cst_19 = arith.constant dense<0.000000e+00> : vector<8x32xf32>
    %20 = tpu.matmul %18, %19, %cst_19 {dimension_numbers = #tpu.dot_dimension_numbers<[1], [0], [0], [1], [0, 0, 1, 1], [], []>} : vector<8x4xf32>, vector<4x32xf32>, vector<8x32xf32> -> vector<8x32xf32>
    %21 = arith.addf %17, %20 : vector<8x32xf32>
    %22 = vector.broadcast %2 : vector<1x32xf32> to vector<8x32xf32>
    %23 = arith.addf %21, %22 : vector<8x32xf32>
    %cst_20 = arith.constant 0.000000e+00 : f32
    %24 = vector.broadcast %cst_20 : f32 to vector<8x32xf32>
    %25 = arith.maximumf %23, %24 : vector<8x32xf32>
    %c0_21 = arith.constant 0 : index
    %c0_22 = arith.constant 0 : index
    %26 = vector.load %arg8[%c0_21, %c0_22] : memref<32x16xf32, #tpu.memory_space<vmem>>, vector<32x16xf32>
    %cst_23 = arith.constant dense<0.000000e+00> : vector<8x16xf32>
    %27 = tpu.matmul %25, %26, %cst_23 {dimension_numbers = #tpu.dot_dimension_numbers<[1], [0], [0], [1], [0, 0, 1, 1], [], []>} : vector<8x32xf32>, vector<32x16xf32>, vector<8x16xf32> -> vector<8x16xf32>
    %c0_24 = arith.constant 0 : index
    %c0_25 = arith.constant 0 : index
    %28 = vector.load %arg9[%c0_24, %c0_25] : memref<1x16xf32, #tpu.memory_space<vmem>>, vector<1x16xf32>
    %29 = vector.broadcast %28 : vector<1x16xf32> to vector<8x16xf32>
    %30 = arith.addf %27, %29 : vector<8x16xf32>
    %31 = tpu.iota {dimensions = array<i32: 1>} : vector<8x16xi32>
    %c5_i32 = arith.constant 5 : i32
    %c0_i32 = arith.constant 0 : i32
    %32 = arith.cmpi eq, %c5_i32, %c0_i32 : i32
    %c1_i32 = arith.constant 1 : i32
    %33 = arith.select %32, %c1_i32, %c5_i32 : i32
    %34 = vector.broadcast %33 : i32 to vector<8x16xi32>
    %35 = arith.remsi %31, %34 : vector<8x16xi32>
    %c0_i32_26 = arith.constant 0 : i32
    %36 = vector.broadcast %c0_i32_26 : i32 to vector<8x16xi32>
    %37 = arith.cmpi ne, %35, %36 : vector<8x16xi32>
    %c0_i32_27 = arith.constant 0 : i32
    %38 = vector.broadcast %c0_i32_27 : i32 to vector<8x16xi32>
    %39 = arith.cmpi slt, %35, %38 : vector<8x16xi32>
    %c0_i32_28 = arith.constant 0 : i32
    %40 = arith.cmpi slt, %33, %c0_i32_28 : i32
    %41 = vector.broadcast %40 : i1 to vector<8x16xi1>
    %42 = vector.broadcast %41 : vector<8x16xi1> to vector<8x16xi1>
    %43 = arith.xori %39, %42 : vector<8x16xi1>
    %44 = arith.andi %43, %37 : vector<8x16xi1>
    %45 = vector.broadcast %33 : i32 to vector<8x16xi32>
    %46 = arith.addi %35, %45 : vector<8x16xi32>
    %47 = arith.select %44, %46, %35 : vector<8x16xi1>, vector<8x16xi32>
    %c0_i32_29 = arith.constant 0 : i32
    %48 = vector.broadcast %c0_i32_29 : i32 to vector<8x16xi32>
    %49 = arith.cmpi ne, %47, %48 : vector<8x16xi32>
    %50 = arith.extui %49 : vector<8x16xi1> to vector<8x16xi32>
    %51 = arith.sitofp %50 : vector<8x16xi32> to vector<8x16xf32>
    %52 = arith.negf %30 : vector<8x16xf32>
    %53 = math.exp %52 : vector<8x16xf32>
    %cst_30 = arith.constant 1.000000e+00 : f32
    %54 = vector.broadcast %cst_30 : f32 to vector<8x16xf32>
    %55 = arith.addf %54, %53 : vector<8x16xf32>
    %56 = arith.divf %54, %55 : vector<8x16xf32>
    %57 = arith.mulf %56, %51 : vector<8x16xf32>
    %c0_31 = arith.constant 0 : index
    %c0_32 = arith.constant 0 : index
    %58 = vector.load %arg10[%c0_31, %c0_32] : memref<8x16xf32, #tpu.memory_space<vmem>>, vector<8x16xf32>
    tpu.vector_store %arg10[%c0_31, %c0_32], %57 {strides = array<i32>} : memref<8x16xf32, #tpu.memory_space<vmem>>, vector<8x16xf32>,
    return
  }
  func.func @transform_0(%arg0: i32) -> (i32, i32) {
    %c0_i32 = arith.constant 0 : i32
    %c0_i32_0 = arith.constant 0 : i32
    return %arg0, %c0_i32 : i32, i32
  }
  func.func @transform_1(%arg0: i32) -> (i32, i32) {
    %c0_i32 = arith.constant 0 : i32
    %c0_i32_0 = arith.constant 0 : i32
    return %arg0, %c0_i32 : i32, i32
  }
  func.func @transform_2(%arg0: i32) -> (i32, i32) {
    %c0_i32 = arith.constant 0 : i32
    %c0_i32_0 = arith.constant 0 : i32
    %c0_i32_1 = arith.constant 0 : i32
    return %c0_i32, %c0_i32_0 : i32, i32
  }
  func.func @transform_3(%arg0: i32) -> (i32, i32) {
    %c0_i32 = arith.constant 0 : i32
    %c0_i32_0 = arith.constant 0 : i32
    %c0_i32_1 = arith.constant 0 : i32
    return %c0_i32, %c0_i32_0 : i32, i32
  }
  func.func @transform_4(%arg0: i32) -> (i32, i32) {
    %c0_i32 = arith.constant 0 : i32
    %c0_i32_0 = arith.constant 0 : i32
    %c0_i32_1 = arith.constant 0 : i32
    return %c0_i32, %c0_i32_0 : i32, i32
  }
  func.func @transform_5(%arg0: i32) -> (i32, i32) {
    %c0_i32 = arith.constant 0 : i32
    %c0_i32_0 = arith.constant 0 : i32
    %c0_i32_1 = arith.constant 0 : i32
    return %c0_i32, %c0_i32_0 : i32, i32
  }
  func.func @transform_6(%arg0: i32) -> (i32, i32) {
    %c0_i32 = arith.constant 0 : i32
    %c0_i32_0 = arith.constant 0 : i32
    %c0_i32_1 = arith.constant 0 : i32
    return %c0_i32, %c0_i32_0 : i32, i32
  }
  func.func @transform_7(%arg0: i32) -> (i32, i32) {
    %c0_i32 = arith.constant 0 : i32
    %c0_i32_0 = arith.constant 0 : i32
    %c0_i32_1 = arith.constant 0 : i32
    return %c0_i32, %c0_i32_0 : i32, i32
  }
  func.func @transform_8(%arg0: i32) -> (i32, i32) {
    %c0_i32 = arith.constant 0 : i32
    %c0_i32_0 = arith.constant 0 : i32
    %c0_i32_1 = arith.constant 0 : i32
    return %c0_i32, %c0_i32_0 : i32, i32
  }
  func.func @transform_9(%arg0: i32) -> (i32, i32) {
    %c0_i32 = arith.constant 0 : i32
    %c0_i32_0 = arith.constant 0 : i32
    return %arg0, %c0_i32 : i32, i32
  }
}

</mosaic_0001>

<bundles_post_ra>
// kernel: simple_causal_net_forward.1
= control target key start
LH: loop header
LB: loop body
LE: loop exit
PB: predicated region body
PF: predicated region fallthrough
CT: control target
= control target key end

     0   :  { %vm45_vm0 = vcmask 1043456   ;;  %vm41_vm1 = vcmask 31744   ;;  %v565_v0 = vmov 0.0   ;;  %vm566_vm2 = vmmov 0   ;;  %s716_s2 = inlined_call_operand.vmem [shape: f32[4,32], index: 2, kind: input, shape index: {}]   ;;  %s717_s0 = inlined_call_operand.vmem [shape: f32[8,4], index: 0, kind: input, shape index: {}]   ;;  %s718_s3 = inlined_call_operand.vmem [shape: f32[32,32], index: 3, kind: input, shape index: {}]   ;;  %s719_s5 = inlined_call_operand.vmem [shape: f32[4,32], index: 5, kind: input, shape index: {}]   ;;  %s720_s1 = inlined_call_operand.vmem [shape: f32[8,4], index: 1, kind: input, shape index: {}]   ;;  %s721_s4 = inlined_call_operand.vmem [shape: f32[32,32], index: 4, kind: input, shape index: {}]   ;;  %s722_s6 = inlined_call_operand.vmem [shape: f32[3,32], index: 6, kind: input, shape index: {}]   ;;  %s723_s7 = inlined_call_operand.vmem [shape: f32[32,16], index: 7, kind: input, shape index: {}]   ;;  %s724_s8 = inlined_call_operand.vmem [shape: f32[1,16], index: 8, kind: input, shape index: {}]   ;;  %s725_s9 = inlined_call_operand.vmem [shape: f32[8,16], index: 9, kind: output, shape index: {}]  }
   0x1   :  { %514 = vmatprep.subr.mxu0 %v565_v0  ;;  %v36_v1 = vld [vmem:[%s716_s2] sm:$0xf]  ;;  %516 = vmatprep.mubr.msk.f32.mxu0 %vm566_vm2, %v565_v0  ;;  %v123_v3 = vld [vmem:[%s718_s3 + $0x18] sm:$0xff]  ;;  %v122_v4 = vld [vmem:[%s718_s3 + $0x10] sm:$0xff]  ;;  %vm128_vm3 = vcmask 261120   ;;  %v448_v35 = vlaneseq  ;;  %vm476_vm8 = vcmask 130048  }
   0x2   :  { %v35_v2 = vld [vmem:[%s717_s0] sm:$0xff]  ;;  %515 = vmatpush3.msk.msra.mxu0 %vm45_vm0, %v36_v1  ;;  %519 = vmatprep.subr.mxu1 %v565_v0  ;;  %v121_v5 = vld [vmem:[%s718_s3 + $0x8] sm:$0xff]  ;;  %v206_v9 = vld [vmem:[%s721_s4 + $0x18] sm:$0xff] }
   0x3   :  { %517 = vmatmul.mubr.msk.f32.vlgmr.msra.gmra.mxu0 %vm41_vm1, %v35_v2  ;;  %520 = vmatpush3.msra.mxu1 %v123_v3  ;;  %v120_v6 = vld [vmem:[%s718_s3] sm:$0xff]  ;;  %v205_v15 = vld [vmem:[%s721_s4 + $0x10] sm:$0xff]  ;;  %v204_v16 = vld [vmem:[%s721_s4 + $0x8] sm:$0xff]  ;;  %v449_v36 = vand.u32 127, %v448_v35 }
   0x4   :  { %521 = vmatprep.subr.mxu1 %v565_v0  ;;  %527 = vmatprep.mubr.msk.f32.mxu1 %vm566_vm2, %v565_v0  ;;  %v208_v7 = vld [vmem:[%s719_s5] sm:$0xf]  ;;  %v367_v25 = vld [vmem:[%s723_s7 + $0x18] sm:$0xff]  ;;  %v366_v26 = vld [vmem:[%s723_s7 + $0x10] sm:$0xff] }
   0x5   :  { %530 = vmatprep.subr.mxu0 %v565_v0  ;;  %532 = vmatprep.mubr.msk.f32.mxu0 %vm566_vm2, %v565_v0  ;;  %v207_v8 = vld [vmem:[%s720_s1] sm:$0xff]  ;;  %v365_v27 = vld [vmem:[%s723_s7 + $0x8] sm:$0xff]  ;;  %v708_v39 = vmul.u32.u64.low 3435973837, %v449_v36  ;;  %v709_v40 = vmul.u32.u64.high 3435973837, %v449_v36, %v708_v39 }
   0x6   :  { %522 = vmatpush3.msra.mxu1 %v122_v4  ;;  %531 = vmatpush3.msk.msra.mxu0 %vm45_vm0, %v208_v7  ;;  %v482_v10 = vld [vmem:[%s722_s6] ss:$0 sm:$0xff]  ;;  %v485_v20 = vld [vmem:[%s722_s6 + $0x1] ss:$0 sm:$0xff]  ;;  %v490_v29 = vld [vmem:[%s722_s6 + $0x2] ss:$0 sm:$0xff] }
   0x7   :  { %523 = vmatprep.subr.mxu1 %v565_v0  ;;  %533 = vmatmul.mubr.msk.f32.vlgmr.msra.gmra.mxu0 %vm41_vm1, %v207_v8  ;;  %v203_v17 = vld [vmem:[%s721_s4] sm:$0xff]  ;;  %v456_v44 = vshrl.u32 %v709_v40, 2 }
   0x8   :  { %524 = vmatpush3.msra.mxu1 %v121_v5  ;;  %535 = vmatprep.subr.mxu0 %v565_v0  ;;  %v364_v28 = vld [vmem:[%s723_s7] sm:$0xff] }
   0x9   :  { %525 = vmatprep.subr.mxu1 %v565_v0  ;;  %536 = vmatpush3.msra.mxu0 %v206_v9  ;;  %v491_v37 = vld [vmem:[%s724_s8] ss:$0 sm:$0xff]  ;;  %v457_v45 = vmul.u32 5, %v456_v44 }
   0xa   :  { %526 = vmatpush3.msra.mxu1 %v120_v6  ;;  %543 = vmatprep.mubr.msk.f32.mxu0 %vm566_vm2, %v565_v0 }
   0xb   :  { %546 = vmatprep.subr.mxu1 %v565_v0  ;;  %537 = vmatprep.subr.mxu0 %v565_v0  ;;  %v458_v46 = vsub.s32 %v449_v36, %v457_v45 }
   0xc   :  { %538 = vmatpush3.msra.mxu0 %v205_v15 }
   0xd   :  { %539 = vmatprep.subr.mxu0 %v565_v0  ;;  %vm461_vm4 = vcmp.ne.s32.totalorder %v458_v46, 0  ;;  %vm462_vm5 = vcmp.lt.s32.totalorder %v458_v46, 0  ;;  %v464_v49 = vadd.s32 5, %v458_v46 }
   0xe   :  { %540 = vmatpush3.msra.mxu0 %v204_v16  ;;  %vm463_vm6 = vmand %vm462_vm5, %vm461_vm4 }
   0xf   :  { %541 = vmatprep.subr.mxu0 %v565_v0  ;;  %v465_v50 = vsel %vm463_vm6, %v464_v49, %v458_v46 }
  0x10   :  { %542 = vmatpush3.msra.mxu0 %v203_v17  ;;  %vm466_vm7 = vcmp.ne.s32.totalorder %v465_v50, 0 }
  0x11   :  { %v493_v51 = vsel %vm466_vm7, 1.0, %v565_v0 }
  0xc3   :  { %v115_v11 = vpop.f32.mrf.mxu0 }
  0xc4   :  { %v116_v12 = vadd.f32 %v482_v10, %v115_v11 }
  0xc5   :  { %v518_v13 = vpop.f32.mrf.mxu0 }
  0xc6   :  { %v119_v14 = vmax.f32 %v116_v12, 0.0 }
  0xc7   :  { %v281_v18 = vpop.f32.mrf.mxu0 }
  0xc8   :  { %528 = vmatmul.mubr.msk.f32.vlgmr.msra.gmra.mxu1 %vm128_vm3, %v119_v14 }
  0xc9   :  { %554 = vmatprep.mubr.msk.f32.mxu1 %vm566_vm2, %v565_v0  ;;  %v534_v19 = vpop.f32.mrf.mxu0  ;;  %547 = vmatpush3.msra.mxu1 %v367_v25 }
  0xca   :  { %548 = vmatprep.subr.mxu1 %v565_v0 }
  0xcb   :  { %549 = vmatpush3.msra.mxu1 %v366_v26 }
  0xcc   :  { %550 = vmatprep.subr.mxu1 %v565_v0 }
  0xcd   :  { %551 = vmatpush3.msra.mxu1 %v365_v27 }
  0xce   :  { %552 = vmatprep.subr.mxu1 %v565_v0 }
  0xcf   :  { %553 = vmatpush3.msra.mxu1 %v364_v28 }
 0x188   :  { %v198_v21 = vpop.f32.mrf.mxu1 }
 0x189   :  { %v199_v22 = vadd.f32 %v485_v20, %v198_v21 }
 0x18a   :  { %v529_v23 = vpop.f32.mrf.mxu1 }
 0x18b   :  { %v202_v24 = vmax.f32 %v199_v22, 0.0 }
 0x18d   :  { %544 = vmatmul.mubr.msk.f32.vlgmr.msra.gmra.mxu0 %vm128_vm3, %v202_v24 }
 0x24d   :  { %v354_v30 = vpop.f32.mrf.mxu0 }
 0x24e   :  { %v355_v31 = vadd.f32 %v354_v30, %v281_v18 }
 0x24f   :  { %v545_v32 = vpop.f32.mrf.mxu0 }
 0x250   :  { %v362_v33 = vadd.f32 %v490_v29, %v355_v31 }
 0x252   :  { %v363_v34 = vmax.f32 %v362_v33, 0.0 }
 0x254   :  { %555 = vmatmul.mubr.msk.f32.vlgmr.msra.gmra.mxu1 %vm128_vm3, %v363_v34 }
 0x314   :  { %v444_v38 = vpop.f32.mrf.mxu1 }
 0x315   :  { %v445_v41 = vadd.f32 %v491_v37, %v444_v38 }
 0x316   :  { %v556_v42 = vpop.f32.mrf.mxu1 }
 0x317   :  { %v494_v43 = vmul.f32 -1.442695, %v445_v41 }
 0x319   :  { %561 = vpow2.f32 %v494_v43 }
 0x326   :  { %v562_v47 = vpop.eup %561 }
 0x327   :  { %v472_v48 = vadd.f32 1.0, %v562_v47 }
 0x329   :  { %563 = vrcp.f32 %v472_v48 }
 0x336   :  { %v564_v52 = vpop.eup %563 }
 0x337   :  { %v475_v53 = vmul.f32 %v564_v52, %v493_v51 }
 0x339   :  { %477 = vst.msk [vmem:[%s725_s9] sm:$0xff] %vm476_vm8, %v475_v53 }

</bundles_post_ra>
